<compile_context>
chip_gen: v6e
topology: v6e:2x2x1
jax: 0.10.0
libtpu: 0.0.40
codegen_flags: <defaults>
</compile_context>

<pallas_src>
import functools

import jax
import jax.numpy as jnp
from jax.experimental import pallas as pl
from jax.experimental.pallas import tpu as pltpu

LANE = 128
VPU_MAX_K = 4            # in_var <= this -> VPU broadcast path (no MXU)
K_TILE_TARGET = 512      # in_var > this -> K-tiled MXU path
TN_MAX = 2048            # max feature-tile lanes
OUT_BLOCK_TARGET = 4 << 20   # ~4 MiB per output block
FALLBACK_ELEMS = 1 << 17     # below this, plain XLA is faster than a pallas_call


def _round_up(x, m):
    return (x + m - 1) // m * m


# ----------------------------------------------------------------------------
# layout / tiling helpers (deterministic from shapes; shared by prepare_params
# and padded_layer so parameter prep happens exactly once)
# ----------------------------------------------------------------------------
def _layout(in_var, features):
    """Returns (k_pad, f_pad, tk, use_mxu)."""
    f_pad = _round_up(features, LANE)
    use_mxu = in_var > VPU_MAX_K
    if use_mxu and in_var > K_TILE_TARGET:
        k_pad = _round_up(in_var, LANE)
        tk = min(k_pad, K_TILE_TARGET)
        while k_pad % tk:           # largest multiple of 128 dividing k_pad
            tk -= LANE
    else:
        k_pad = in_var
        tk = in_var
    return k_pad, f_pad, tk, use_mxu


def _vmem_budget():
    cap = 64 << 20
    try:
        info = pltpu.get_tpu_info()
        cap = int(getattr(info, "vmem_capacity_bytes", cap)) or cap
    except Exception:
        pass
    return min(cap // 2, 48 << 20)


def _vmem_need(tb, tn, tk, out_bytes, with_acc):
    need = 2 * tb * tn * out_bytes       # output (double-buffered)
    need += 2 * tb * max(tk, 1) * 4      # x blocks
    need += 2 * max(tk, 1) * tn * 4      # W blocks
    need += 2 * 8 * tn * 4               # bias (sublane-padded)
    if with_acc:
        need += tb * tn * 4              # f32 accumulator scratch
    return need


def _choose_tiles(B, f_pad, tk, out_bytes, budget, with_acc):
    # feature tile: largest multiple of 128 <= min(f_pad, TN_MAX) dividing f_pad
    tn = min(f_pad, TN_MAX)
    while f_pad % tn:
        tn -= LANE
    # batch tile: target ~OUT_BLOCK_TARGET bytes per output block
    row_align = 16 if out_bytes < 4 else 8
    tb = max(row_align, (OUT_BLOCK_TARGET // (tn * out_bytes)) // row_align * row_align)
    tb = min(tb, _round_up(B, row_align))
    # shrink to fit the VMEM budget
    while _vmem_need(tb, tn, tk, out_bytes, with_acc) > budget and tb > row_align:
        tb = max(row_align, (tb // 2) // row_align * row_align)
    while _vmem_need(tb, tn, tk, out_bytes, with_acc) > budget and tn > LANE:
        tn_next = tn - LANE
        while f_pad % tn_next:
            tn_next -= LANE
        tn = tn_next
    return tb, tn, row_align


# ----------------------------------------------------------------------------
# kernels
# ----------------------------------------------------------------------------
def _vpu_kernel(in_var, x_ref, w_ref, b_ref, o_ref):
    """Tiny-K path: y = sum_k x[:, k] * w[k, :] + b, then exp (VPU + EUP only)."""
    x = x_ref[...]                           # (tb, in_var)
    w = w_ref[...]                           # (in_var, tn)
    acc = b_ref[...] + x[:, 0:1] * w[0:1, :]
    for k in range(1, in_var):               # static unroll, in_var <= VPU_MAX_K
        acc = acc + x[:, k:k + 1] * w[k:k + 1, :]
    o_ref[...] = jnp.exp(acc).astype(o_ref.dtype)


def _mxu_kernel(x_ref, w_ref, b_ref, o_ref, acc_ref):
    """MXU path with K tiling (K axis last in the grid, possibly size 1)."""
    k = pl.program_id(2)

    @pl.when(k == 0)
    def _():
        acc_ref[...] = jnp.zeros_like(acc_ref)

    acc_ref[...] += jnp.dot(x_ref[...], w_ref[...],
                            preferred_element_type=jnp.float32)

    @pl.when(k == pl.num_programs(2) - 1)
    def _():
        o_ref[...] = jnp.exp(acc_ref[...] + b_ref[...]).astype(o_ref.dtype)


# ----------------------------------------------------------------------------
# parameter prep (one-time) and forward wrapper
# ----------------------------------------------------------------------------
def prepare_params(weight, bias):
    """One-time prep. weight: (features, in_var) nn.Linear layout; bias: (features,).
    Returns W transposed to (k_pad, f_pad) and bias as (1, f_pad), zero-padded so
    the feature dim is a lane multiple and (for large in_var) K is K-tileable."""
    features, in_var = weight.shape
    k_pad, f_pad, _, _ = _layout(in_var, features)
    w_t = jnp.zeros((k_pad, f_pad), jnp.float32)
    w_t = w_t.at[:in_var, :features].set(jnp.asarray(weight, jnp.float32).T)
    b2 = jnp.zeros((1, f_pad), jnp.float32)
    b2 = b2.at[0, :features].set(jnp.asarray(bias, jnp.float32))
    return w_t, b2


def padded_layer(x, w_pad, b_pad, features, *, out_dtype=jnp.float32,
                 allow_xla_fallback=True):
    """x: (B, in_var) f32; w_pad/b_pad from prepare_params. Returns (B, features)."""
    B, in_var = x.shape
    k_pad, f_pad, tk, use_mxu = _layout(in_var, features)
    assert w_pad.shape == (k_pad, f_pad) and b_pad.shape == (1, f_pad)

    x = x.astype(jnp.float32)

    # Tiny problems: pallas_call fixed cost dominates; let fused XLA handle it.
    if allow_xla_fallback and B * f_pad < FALLBACK_ELEMS:
        y = jnp.dot(x, w_pad[:in_var, :features],
                    precision=jax.lax.Precision.HIGHEST) + b_pad[0, :features]
        return jnp.exp(y).astype(out_dtype)

    # Zero-pad K only when K-tiling requires it (zeros contribute nothing).
    if k_pad != in_var:
        x = jnp.pad(x, ((0, 0), (0, k_pad - in_var)))

    out_bytes = jnp.dtype(out_dtype).itemsize
    budget = _vmem_budget()
    tb, tn, row_align = _choose_tiles(B, f_pad, tk, out_bytes, budget, use_mxu)

    n_b = pl.cdiv(B, tb)
    n_n = f_pad // tn
    # v7x: make sure the parallel axes have >= 2 grid points so both TCs work.
    if n_b * n_n < 2 and B > row_align:
        tb = _round_up(pl.cdiv(B, 2), row_align)
        n_b = pl.cdiv(B, tb)

    need = _vmem_need(tb, tn, tk, out_bytes, use_mxu)
    vmem_limit = int(min(budget, max(need + (4 << 20), 16 << 20)))

    cost = pl.CostEstimate(
        flops=int(2 * B * max(k_pad, 1) * f_pad + B * f_pad),
        transcendentals=int(B * f_pad),
        bytes_accessed=int(4 * (B * k_pad + k_pad * f_pad + f_pad)
                           + out_bytes * B * f_pad),
    )

    if not use_mxu:
        out = pl.pallas_call(
            functools.partial(_vpu_kernel, in_var),
            out_shape=jax.ShapeDtypeStruct((B, f_pad), out_dtype),
            grid=(n_b, n_n),
            in_specs=[
                pl.BlockSpec((tb, in_var), lambda i, j: (i, 0)),   # x
                pl.BlockSpec((in_var, tn), lambda i, j: (0, j)),   # W
                pl.BlockSpec((1, tn), lambda i, j: (0, j)),        # bias
            ],
            out_specs=pl.BlockSpec((tb, tn), lambda i, j: (i, j)),
            compiler_params=pltpu.CompilerParams(
                dimension_semantics=("parallel", "parallel"),
                vmem_limit_bytes=vmem_limit),
            cost_estimate=cost,
        )(x, w_pad, b_pad)
    else:
        n_k = k_pad // tk
        out = pl.pallas_call(
            _mxu_kernel,
            out_shape=jax.ShapeDtypeStruct((B, f_pad), out_dtype),
            grid=(n_b, n_n, n_k),
            in_specs=[
                pl.BlockSpec((tb, tk), lambda i, j, k: (i, k)),    # x
                pl.BlockSpec((tk, tn), lambda i, j, k: (k, j)),    # W
                pl.BlockSpec((1, tn), lambda i, j, k: (0, j)),     # bias
            ],
            out_specs=pl.BlockSpec((tb, tn), lambda i, j, k: (i, j)),
            scratch_shapes=[pltpu.VMEM((tb, tn), jnp.float32)],
            compiler_params=pltpu.CompilerParams(
                dimension_semantics=("parallel", "parallel", "arbitrary"),
                vmem_limit_bytes=vmem_limit),
            cost_estimate=cost,
        )(x, w_pad, b_pad)

    if f_pad != features:
        out = out[:, :features]     # skipped entirely when features % 128 == 0
    return out


def padded_layer_ref(x, weight, bias):
    y = jnp.dot(x, weight.T, precision=jax.lax.Precision.HIGHEST) + bias[None, :]
    return jnp.exp(y)


# ----------------------------------------------------------------------------
if __name__ == "__main__":
    def make_case(key, batch, in_var, features, w_scale, b_scale):
        kx, kw, kb = jax.random.split(key, 3)
        x = jax.random.normal(kx, (batch, in_var), jnp.float32)
        w = jax.random.normal(kw, (features, in_var), jnp.float32) * w_scale
        b = jax.random.normal(kb, (features,), jnp.float32) * b_scale
        return x, w, b

    master = jax.random.PRNGKey(0)
    cases = [
        # (batch, in_var, features, w_scale, rtol, atol)
        (64, 1,   40,  0.50, 1e-5, 1e-5),   # default PaddedLayer -> VPU path
        (40, 96,  256, 0.02, 1e-3, 1e-3),   # MXU path, single K step, ragged batch
        (32, 640, 384, 0.01, 1e-3, 1e-3),   # MXU path with K tiling (in_var > 512)
    ]
    keys = jax.random.split(master, len(cases))
    for (batch, in_var, features, w_scale, rtol, atol), k in zip(cases, keys):
        x, w, b = make_case(k, batch, in_var, features, w_scale, 0.1)
        w_pad, b_pad = prepare_params(w, b)          # one-time parameter prep
        out = jax.block_until_ready(
            padded_layer(x, w_pad, b_pad, features, allow_xla_fallback=False))
        ref = padded_layer_ref(x, w, b)
        assert out.shape == (batch, features), (out.shape, batch, features)
        assert jnp.allclose(out, ref, rtol=rtol, atol=atol), \
            f"mismatch at case (B={batch}, K={in_var}, F={features})"

    # tiny-problem path defers to fused XLA (pallas fixed cost would dominate)
    x, w, b = make_case(jax.random.PRNGKey(1), 8, 1, 40, 0.5, 0.1)
    w_pad, b_pad = prepare_params(w, b)
    out = jax.block_until_ready(padded_layer(x, w_pad, b_pad, 40))
    assert jnp.allclose(out, padded_layer_ref(x, w, b), rtol=1e-5, atol=1e-5)

    print("KERNEL_OK")
</pallas_src>

<mosaic_0001>
module attributes {stable_mosaic.version = 11 : i64} {
  func.func @_vpu_kernel(%arg0: i32, %arg1: i32, %arg2: memref<32x1xf32, #tpu.memory_space<vmem>>, %arg3: memref<1x128xf32, #tpu.memory_space<vmem>>, %arg4: memref<1x128xf32, #tpu.memory_space<vmem>>, %arg5: memref<32x128xf32, #tpu.memory_space<vmem>>) attributes {dimension_semantics = [#tpu.dimension_semantics<parallel>, #tpu.dimension_semantics<parallel>], iteration_bounds = array<i64: 2, 1>, scalar_prefetch = 0 : i64, scratch_operands = 0 : i64, tpu.core_type = #tpu.core_type<tc>, window_params = [{transform_indices = @transform_0, window_bounds = array<i64: 32, 1>}, {transform_indices = @transform_1, window_bounds = array<i64: 1, 128>}, {transform_indices = @transform_2, window_bounds = array<i64: 1, 128>}, {transform_indices = @transform_3, window_bounds = array<i64: 32, 128>}]} {
    %c0 = arith.constant 0 : index
    %c0_0 = arith.constant 0 : index
    %0 = vector.load %arg2[%c0, %c0_0] : memref<32x1xf32, #tpu.memory_space<vmem>>, vector<32x1xf32>
    %c0_1 = arith.constant 0 : index
    %c0_2 = arith.constant 0 : index
    %1 = vector.load %arg3[%c0_1, %c0_2] : memref<1x128xf32, #tpu.memory_space<vmem>>, vector<1x128xf32>
    %c0_3 = arith.constant 0 : index
    %c0_4 = arith.constant 0 : index
    %2 = vector.load %arg4[%c0_3, %c0_4] : memref<1x128xf32, #tpu.memory_space<vmem>>, vector<1x128xf32>
    %3 = vector.broadcast %0 : vector<32x1xf32> to vector<32x128xf32>
    %4 = vector.broadcast %1 : vector<1x128xf32> to vector<32x128xf32>
    %5 = arith.mulf %3, %4 : vector<32x128xf32>
    %6 = vector.broadcast %2 : vector<1x128xf32> to vector<32x128xf32>
    %7 = arith.addf %6, %5 : vector<32x128xf32>
    %8 = math.exp %7 : vector<32x128xf32>
    %c0_5 = arith.constant 0 : index
    %c0_6 = arith.constant 0 : index
    %9 = vector.load %arg5[%c0_5, %c0_6] : memref<32x128xf32, #tpu.memory_space<vmem>>, vector<32x128xf32>
    tpu.vector_store %arg5[%c0_5, %c0_6], %8 {strides = array<i32>} : memref<32x128xf32, #tpu.memory_space<vmem>>, vector<32x128xf32>,
    return
  }
  func.func @transform_0(%arg0: i32, %arg1: i32) -> (i32, i32) {
    %c0_i32 = arith.constant 0 : i32
    %c0_i32_0 = arith.constant 0 : i32
    return %arg0, %c0_i32 : i32, i32
  }
  func.func @transform_1(%arg0: i32, %arg1: i32) -> (i32, i32) {
    %c0_i32 = arith.constant 0 : i32
    %c0_i32_0 = arith.constant 0 : i32
    return %c0_i32, %arg1 : i32, i32
  }
  func.func @transform_2(%arg0: i32, %arg1: i32) -> (i32, i32) {
    %c0_i32 = arith.constant 0 : i32
    %c0_i32_0 = arith.constant 0 : i32
    return %c0_i32, %arg1 : i32, i32
  }
  func.func @transform_3(%arg0: i32, %arg1: i32) -> (i32, i32) {
    %c0_i32 = arith.constant 0 : i32
    return %arg0, %arg1 : i32, i32
  }
}

</mosaic_0001>

<bundles_post_ra>
// kernel: tpu_custom_call.1
= control target key start
LH: loop header
LB: loop body
LE: loop exit
PB: predicated region body
PF: predicated region fallthrough
CT: control target
= control target key end

     0   :  { %8 = vsyncpa [#allocation3], 0  ;;  %s690_s0 = inlined_call_operand.vmem [shape: f32[64,1], index: 0, kind: input, shape index: {}]   ;;  %s691_s1 = inlined_call_operand.vmem [shape: f32[1,128], index: 1, kind: input, shape index: {}]   ;;  %s692_s2 = inlined_call_operand.vmem [shape: f32[1,128], index: 2, kind: input, shape index: {}]   ;;  %s693_s3 = inlined_call_operand.hbm [shape: f32[64,128], index: 3, kind: output, shape index: {}]  }
   0x1   :  { %10 = vsyncpa [#allocation3 + $0x1], 0  ;;  %s571_s12 = smov 0   ;;  %s573_s13 = smov 0  }
   0x2   :  { %s575_s14 = smov 0   ;;  %s577_s15 = smov 0  }
   0x3   :  { %s579_s16 = smov 0   ;;  %s581_s17 = smov 0  }
   0x4 LB: > { %s383_s18 = sadd.s32 4294967295, %s545_s17   ;;  %s384_s19 = sadd.s32 4294967294, %s545_s17   ;;  %s545_s17 = sphi %s581_s17, %s16_s17   ;;  %s541_s16 = sphi %s579_s16, %s700_s16   ;;  %s537_s15 = sphi %s577_s15, %s699_s15   ;;  %s533_s14 = sphi %s575_s14, %s698_s14   ;;  %s529_s13 = sphi %s573_s13, %s697_s13   ;;  %s525_s12 = sphi %s571_s12, %s696_s12  }
   0x5   : > { %s28_s20 = sadd.s32 1, %s541_s16  ;;  %s115_s21 = sadd.s32 1, %s533_s14 }
   0x6   : > { %p30_p0 = scmp.ge.s32.totalorder %s28_s20, 2  ;;  %p125_p1 = scmp.ne.s32.totalorder %s533_s14, %s529_s13 }
   0x7   : > { %p126_p2 = scmp.eq.s32.totalorder %s383_s18, 1  ;;  %p131_p3 = scmp.ne.s32.totalorder %s529_s13, %s525_s12 }
   0x8   : > { %s702_s20 = smov (%p30_p0, %s28_s20), 0  ;;  %p132_p5 = scmp.eq.s32.totalorder %s384_s19, 1 }
   0x9   : > { %p611_p4 = por %p126_p2, %p125_p1  ;;  %s110_s23 = ssub.s32 %s541_s16, %s702_s20 }
   0xa   : > { %p389_p6 = scmp.ge.s32.totalorder %s545_s17, 1  ;;  %p113_p7 = scmp.eq.s32.totalorder %s110_s23, 0 }
   0xb   : > { %p618_p8 = por %p132_p5, %p131_p3  ;;  %p171_p9 = scmp.lt.s32.totalorder %s545_s17, 3 }
   0xc   : > { %s624_s25 = scalar_select %p113_p7, %s533_s14, %s115_s21  }
   0xd   : > { %p172_p10 = pnand %p389_p6, %p171_p9 }
   0xe   : > { %s391_s26 = sshll.u32 (!%p172_p10), %s537_s15, 2  ;;  %s198_s8 = sand.u32 (!%p172_p10), 1, %s529_s13  }
   0xf   : > { %175 = sbr.rel (%p172_p10) target bundleno = 187 (0xbb), region = 32  ;;  %p202_p11 = scmp.lt.s32.totalorder (!%p172_p10), %s391_s26, 7 }
  0x10   : > { %s390_s9 = sshll.u32 (!%p172_p10), %s198_s8, 5  ;;  %s400_s10 = sshll.u32 (!%p172_p10), %s537_s15, 9 }
  0x11   : > { %s200_s11 = scalar_lea.vmem (!%p172_p10), [#allocation2], %s390_s9  ;;  %s641_s23 = scalar_lea.hbm (!%p172_p10), %s693_s3, %s400_s10 }
  0x12   : > { %s287_s18 = sshll.u32 (!%p172_p10), %s200_s11, 4  ;;  %s645_s15 = scalar_lea.sflag (!%p172_p10), [#allocation3], %s198_s8  ;;  %s643_s18 = int_to_ptr.vmem [resolvable:$true] %s287_s18 }
  0x14   : > { %v547_v0 = vmov 0   ;;  %s704_s26 = smov (!%p202_p11, %s391_s26), 7  ;;  %v393_v5 = vld [vmem:[%s691_s1] ss:$0 sm:$0xff] }
  0x15   : > { %460 = vset.pattern.permute.xlu1 %v547_v0  ;;  %459 = vset.pattern.permute.xlu0 %v547_v0  ;;  %s392_s27 = sshll.u32 %s704_s26, 3  ;;  %v394_v6 = vld [vmem:[%s692_s2] ss:$0 sm:$0xff]  ;;  %s469_s26 = scalar_lea.vmem %s643_s18, 512 }
  0x16   : > { %s205_s30 = scalar_lea.vmem %s690_s0, %s392_s27  ;;  %p470_p12 = scmp.ne.s32.totalorder %s643_s18, %s469_s26 }
  0x17   : > { %v216_v1 = vld [vmem:[%s205_s30 + $0x10] sm:$0xff]  ;;  %v214_v2 = vld [vmem:[%s205_s30] sm:$0xff]  ;;  %v217_v3 = vld [vmem:[%s205_s30 + $0x18] sm:$0xff]  ;;  %s548_s27 = smov [#allocation2]  }
  0x18   : > { %232 = vperm.xlu1 %460, %v216_v1   ;;  %222 = vperm.xlu0 %459, %v214_v2   ;;  %v215_v4 = vld [vmem:[%s205_s30 + $0x8] sm:$0xff]  ;;  %p471_p13 = pnand %p470_p12, %p611_p4  ;;  %s473_s28 = sshll.u32 %s548_s27, 4  ;;  %s474_s28 = int_to_ptr.vmem [resolvable:$false] %s473_s28 }
  0x19   : > { %s475_s29 = scalar_lea.vmem %s474_s28, 1024  ;;  %p476_p1 = scmp.lt.s32.totalorder %s643_s18, %s474_s28 }
  0x1a   : > { %p472_p0 = pneg %p471_p13  ;;  %p477_p2 = scmp.lt.s32.totalorder %s475_s29, %s469_s26 }
  0x1c   : > { %237 = vperm.xlu1 %460, %v217_v3   ;;  %227 = vperm.xlu0 %459, %v215_v4   ;;  %p478_p3 = por %p477_p2, %p476_p1 }
  0x1e   : > { %p479_p5 = pnand %p478_p3, %p472_p0 }
  0x93   : > { %v233_v7 = vpop.permute.xlu1 %232  ;;  %v223_v8 = vpop.permute.xlu0 %222 }
  0x94   : > { %v248_v9 = vmul.f32 %v393_v5, %v233_v7  ;;  %v246_v10 = vmul.f32 %v393_v5, %v223_v8 }
  0x96   : > { %v258_v11 = vadd.f32 %v394_v6, %v248_v9  ;;  %v256_v12 = vadd.f32 %v394_v6, %v246_v10 }
  0x97   : > { %v238_v13 = vpop.permute.xlu1 %237  ;;  %v228_v14 = vpop.permute.xlu0 %227 }
  0x98   : > { %v264_v15 = vmul.f32 1.442695, %v258_v11  ;;  %v260_v16 = vmul.f32 1.442695, %v256_v12  ;;  %v249_v17 = vmul.f32 %v393_v5, %v238_v13  ;;  %v247_v18 = vmul.f32 %v393_v5, %v228_v14 }
  0x9a   : > { %461 = vpow2.f32 %v264_v15  ;;  %v259_v19 = vadd.f32 %v394_v6, %v249_v17  ;;  %v257_v20 = vadd.f32 %v394_v6, %v247_v18 }
  0x9b   : > { %463 = vpow2.f32 %v260_v16 }
  0x9c   : > { %v266_v21 = vmul.f32 1.442695, %v259_v19  ;;  %v262_v22 = vmul.f32 1.442695, %v257_v20 }
  0x9e   : > { %465 = vpow2.f32 %v266_v21 }
  0x9f   : > { %467 = vpow2.f32 %v262_v22 }
  0xa7   : > { %v462_v23 = vpop.eup %461 }
  0xa8   : > { %v464_v24 = vpop.eup %463  ;;  %270 = vst [vmem:[%s200_s11 + $0x10] sm:$0xff] %v462_v23 }
  0xa9   : > { %268 = vst [vmem:[%s200_s11] sm:$0xff] %v464_v24 }
  0xab   : > { %v466_v25 = vpop.eup %465 }
  0xac   : > { %v468_v26 = vpop.eup %467  ;;  %271 = vst [vmem:[%s200_s11 + $0x18] sm:$0xff] %v466_v25 }
  0xad   : > { %269 = vst [vmem:[%s200_s11 + $0x8] sm:$0xff] %v468_v26 }
  0xae   : > { %482 = shalt.err (!%p479_p5)
}
  0xaf   : > { %s483_s30 = scalar_lea.hbm %s641_s23, 512  ;;  %s487_s6 = scalar_lea.hbm %s693_s3, 1024 }
  0xb0   : > { %p484_p6 = scmp.ne.s32.totalorder %s641_s23, %s483_s30  ;;  %p488_p10 = scmp.lt.s32.totalorder %s641_s23, %s693_s3 }
  0xb1   : > { %p489_p11 = scmp.lt.s32.totalorder %s487_s6, %s483_s30 }
  0xb2   : > { %p485_p7 = pnand %p484_p6, %p611_p4 }
  0xb3   : > { %p490_p12 = por %p489_p11, %p488_p10 }
  0xb4   : > { %p486_p9 = pneg %p485_p7 }
  0xb6   : > { %p491_p13 = pnand %p490_p12, %p486_p9 }
  0xb8   : > { %494 = shalt.err (!%p491_p13)
}
  0xb9   : > { %s549_s9 = smov 128   ;;  %s550_s10 = smov 8  }
  0xba   : > { %401 = dma.vmem_to_hbm [thread:$0]  (%p611_p4), %s643_s18, 512, %s641_s23, %s645_s15, %s549_s9, %s549_s9, %s550_s10  }
  0xbb PF: > { %p407_p0 = scmp.ge.s32.totalorder %s545_s17, 2  ;;  %s302_s11 = sand.u32 1, %s525_s12  }
  0xbc   : > { %s303_s19 = scalar_lea.sflag [#allocation3], %s302_s11 }
  0xbd   : > { %p404_p1 = pnand %p407_p0, %p618_p8 }
  0xbf   : > { %p405_p2 = pneg %p404_p1 }
  0xc1   : > { %520 = dma.done.wait (%p405_p2), %s303_s19, 512  }
  0xc2   : > { %522 = vsyncadd (%p405_p2), %s303_s19, 4294966784  ;;  %s16_s17 = sadd.s32 1, %s545_s17   ;;  %s696_s12 = smov %s529_s13 }
  0xc3   : > { %p13_p3 = scmp.ge.s32.totalorder %s16_s17, 4   ;;  %s697_s13 = smov %s533_s14 }
  0xc4   : > { %s698_s14 = smov %s624_s25  ;;  %s699_s15 = smov %s541_s16 }
  0xc5   : > { %s700_s16 = smov %s702_s20  ;;  %15 = sbr.rel (!%p13_p3) target bundleno = 4 (0x4), region = 73 }
  0xca   :  { %308 = vsyncpa [#allocation3], 1 }
  0xcb   :  { %310 = vsyncpa [#allocation3 + $0x1], 1 }

</bundles_post_ra>
